<compile_context>
chip_gen: v6e
topology: v6e:2x2x1
jax: 0.10.0
libtpu: 0.0.40
codegen_flags: <defaults>
</compile_context>

<pallas_src>
import jax
import jax.numpy as jnp
from jax.experimental import pallas as pl
from jax.experimental.pallas import tpu as pltpu

CLS_WEIGHT = 1.0
LOC_WEIGHT = 1.2
GIOU_WEIGHT = 1.4

LANES = 128
TR_MAX = 512        # sublane rows per grid step -> 65536 boxes / step
NS = 6              # partial sums: bce, sq, iou, giou, iou^2, cnt


def _cdiv(a, b):
    return -(-a // b)


def _make_kernel(n_valid: int, tr: int, n_inner: int):
    """Build the criterion kernel with static batch size / tiling baked in."""
    tile = tr * LANES

    def kernel(cl_ref, box_ref, out_ref, acc_ref):
        i = pl.program_id(0)          # outer (parallel) axis
        j = pl.program_id(1)          # inner (sequential reduction) axis

        # ---- init the per-block vector accumulator -----------------------
        @pl.when(j == 0)
        def _init():
            acc_ref[...] = jnp.zeros_like(acc_ref)

        # ---- loads (native dtype in HBM/VMEM, cast in-kernel) ------------
        cls = cl_ref[0].astype(jnp.float32)      # (tr, 128) logits
        lbl = cl_ref[1].astype(jnp.float32)      # (tr, 128) labels

        pcx = box_ref[0].astype(jnp.float32)     # predicted cx
        pcy = box_ref[1].astype(jnp.float32)     # predicted cy
        pw = box_ref[2].astype(jnp.float32)      # predicted w
        ph = box_ref[3].astype(jnp.float32)      # predicted h
        tcx = box_ref[4].astype(jnp.float32)     # target cx
        tcy = box_ref[5].astype(jnp.float32)     # target cy
        tw = box_ref[6].astype(jnp.float32)      # target w
        th = box_ref[7].astype(jnp.float32)      # target h

        def fold(x):  # (tr, 128) -> (8, 128): pure VPU vreg adds, no XLU
            return jnp.sum(x.reshape(tr // 8, 8, LANES), axis=0)

        # ---- BCEWithLogits (numerically stable) --------------------------
        bce = jnp.maximum(cls, 0.0) - cls * lbl + jnp.log1p(jnp.exp(-jnp.abs(cls)))

        # Padding is zero-filled by the wrapper; label==0 already excludes
        # padded rows from the masked loc/iou sums.  Only BCE needs boundary
        # handling, done here with step-scalar predicates so the hot path
        # (fully-valid steps) carries zero per-element validity cost.
        step = i * n_inner + j                       # global step index
        rem = jnp.int32(n_valid) - step * tile       # valid elements remaining

        @pl.when(rem >= tile)                        # fully valid step
        def _bce_full():
            acc_ref[0] = acc_ref[0] + fold(bce)

        @pl.when(jnp.logical_and(rem > 0, rem < tile))   # boundary step (<=1)
        def _bce_partial():
            row = jax.lax.broadcasted_iota(jnp.int32, (tr, LANES), 0)
            lane = jax.lax.broadcasted_iota(jnp.int32, (tr, LANES), 1)
            idx = row * LANES + lane
            acc_ref[0] = acc_ref[0] + fold(jnp.where(idx < rem, bce, 0.0))
        # rem <= 0: fully padded step -> contributes nothing to BCE.

        # ---- positive-row mask (padded rows have lbl == 0) ----------------
        mask = lbl != 0.0

        # ---- MSE over masked rows (sum; mean over 4*cnt at finalize) ------
        d0 = pcx - tcx
        d1 = pcy - tcy
        d2 = pw - tw
        d3 = ph - th
        sq = d0 * d0 + d1 * d1 + d2 * d2 + d3 * d3
        acc_ref[1] = acc_ref[1] + fold(jnp.where(mask, sq, 0.0))

        # ---- cxcywh -> xyxy ------------------------------------------------
        ax0 = pcx - 0.5 * pw
        ax1 = pcx + 0.5 * pw
        ay0 = pcy - 0.5 * ph
        ay1 = pcy + 0.5 * ph
        bx0 = tcx - 0.5 * tw
        bx1 = tcx + 0.5 * tw
        by0 = tcy - 0.5 * th
        by1 = tcy + 0.5 * th

        area_a = (ax1 - ax0) * (ay1 - ay0)
        area_b = (bx1 - bx0) * (by1 - by0)

        # ---- diagonal IoU ---------------------------------------------------
        iw = jnp.maximum(jnp.minimum(ax1, bx1) - jnp.maximum(ax0, bx0), 0.0)
        ih = jnp.maximum(jnp.minimum(ay1, by1) - jnp.maximum(ay0, by0), 0.0)
        inter = iw * ih
        union = area_a + area_b - inter
        # where-guard so padded / negative rows never produce Inf/NaN that
        # could leak into the masked sums.  EUP approx reciprocal + 1 Newton
        # step keeps the VALU slot free at ~f32 accuracy.
        # TODO(synk): a *masked* row with a zero-area label box still yields
        # Inf/NaN (PyTorch's dynamic NaN filtering / early `return None` is
        # data-dependent-shape control flow with no TPU kernel equivalent).
        u = jnp.where(mask, union, 1.0)
        ru = pl.reciprocal(u, approx=True)
        inv_union = ru * (2.0 - u * ru)
        iou = inter * inv_union

        # ---- generalized IoU (enclosing box) --------------------------------
        ew = jnp.maximum(jnp.maximum(ax1, bx1) - jnp.minimum(ax0, bx0), 0.0)
        eh = jnp.maximum(jnp.maximum(ay1, by1) - jnp.minimum(ay0, by0), 0.0)
        area_e = ew * eh
        e = jnp.where(mask, area_e, 1.0)
        re = pl.reciprocal(e, approx=True)
        inv_e = re * (2.0 - e * re)
        giou = iou - (area_e - union) * inv_e

        iou_m = jnp.where(mask, iou, 0.0)
        giou_m = jnp.where(mask, giou, 0.0)
        acc_ref[2] = acc_ref[2] + fold(iou_m)
        acc_ref[3] = acc_ref[3] + fold(giou_m)
        acc_ref[4] = acc_ref[4] + fold(iou_m * iou_m)
        acc_ref[5] = acc_ref[5] + fold(mask.astype(jnp.float32))

        # ---- write this outer-block's partial sums on its last inner step ---
        @pl.when(j == n_inner - 1)
        def _write():
            out_ref[0] = acc_ref[...]

    return kernel


def tr2_criterion(cls, loc, label_cls, label_loc):
    """x = (cls [N,1], loc [N,4]); y = (label_cls [N,1], label_loc [N,4])."""
    n = cls.shape[0]
    assert cls.shape == (n, 1) and label_cls.shape == (n, 1)
    assert loc.shape == (n, 4) and label_loc.shape == (n, 4)

    # ---- choose tile / grid (static shapes) --------------------------------
    rows = _cdiv(n, LANES)
    rows8 = _cdiv(rows, 8) * 8                 # sublane multiple
    tr = TR_MAX if rows8 >= TR_MAX else rows8  # shrink tile for tiny batches
    n_steps = _cdiv(rows8, tr)
    # Give the outer ("parallel") axis 2 blocks when there is enough work so a
    # dual-TensorCore chip (v7x) can split the batch; harmless on 1-TC chips.
    if n_steps >= 2:
        n_outer = 2
        n_steps = _cdiv(n_steps, n_outer) * n_outer
    else:
        n_outer = 1
    n_inner = n_steps // n_outer
    total_rows = n_steps * tr
    pad = total_rows * LANES - n

    # ---- lane-dense, coordinate-major relayout ------------------------------
    # NOTE: padding MUST be zeros (the kernel relies on padded labels == 0).
    # TODO(synk): this [N,C] -> [C, rows, 128] transpose+pad is pure layout
    # plumbing in XLA; producing loc/label_loc coordinate-major upstream (or
    # de-interleaving in-kernel via strided DMA) would cut most of the extra
    # end-to-end HBM traffic.
    def planes(a):  # [N, C] -> (C, total_rows, 128)
        c = a.shape[1]
        a = a.T
        if pad:
            a = jnp.pad(a, ((0, 0), (0, pad)))   # zero fill
        return a.reshape(c, total_rows, LANES)

    cls_pack = planes(jnp.concatenate([cls, label_cls], axis=1))   # (2, R, 128)
    box_pack = planes(jnp.concatenate([loc, label_loc], axis=1))   # (8, R, 128)

    kernel = _make_kernel(n, tr, n_inner)

    parts = pl.pallas_call(
        kernel,
        out_shape=jax.ShapeDtypeStruct((n_outer, NS, 8, LANES), jnp.float32),
        grid_spec=pltpu.PrefetchScalarGridSpec(
            num_scalar_prefetch=0,
            grid=(n_outer, n_inner),
            in_specs=[
                pl.BlockSpec((2, tr, LANES), lambda i, j: (0, i * n_inner + j, 0)),
                pl.BlockSpec((8, tr, LANES), lambda i, j: (0, i * n_inner + j, 0)),
            ],
            out_specs=pl.BlockSpec((1, NS, 8, LANES), lambda i, j: (i, 0, 0, 0)),
            scratch_shapes=[pltpu.VMEM((NS, 8, LANES), jnp.float32)],
        ),
        compiler_params=pltpu.CompilerParams(
            dimension_semantics=("parallel", "arbitrary"),
            vmem_limit_bytes=32 * 1024 * 1024,
        ),
    )(cls_pack, box_pack)

    # ---- single final cross-lane reduce + scalar finalize (tiny, in XLA) ----
    sums = jnp.sum(parts, axis=(0, 2, 3))  # (NS,)
    sum_bce = sums[0]
    sum_sq = sums[1]
    sum_iou = sums[2]
    sum_giou = sums[3]
    sum_iou2 = sums[4]
    cnt = sums[5]

    # TODO(synk): PyTorch returns None when <= 1 masked rows remain; divisors
    # are clamped instead (data-dependent early exit has no TPU equivalent).
    cnt_safe = jnp.maximum(cnt, 1.0)
    cls_loss = sum_bce / jnp.float32(n)
    loc_loss = sum_sq / (4.0 * cnt_safe)
    iou_loss = 1.0 - sum_iou / cnt_safe
    giou_loss = 1.0 - sum_giou / cnt_safe
    mean_iou = sum_iou / cnt_safe
    var = (sum_iou2 - cnt * mean_iou * mean_iou) / jnp.maximum(cnt - 1.0, 1.0)
    iou_std = jnp.sqrt(jnp.maximum(var, 0.0))
    total = CLS_WEIGHT * cls_loss + LOC_WEIGHT * loc_loss + GIOU_WEIGHT * iou_loss

    return {
        "cls_loss": cls_loss,
        "loc_loss": loc_loss,
        "giou_loss": giou_loss,
        "iou_loss": iou_loss,
        "iou_var": iou_std,   # matches torch.std (standard deviation)
        "total_loss": total,
    }


def _reference(cls, loc, label_cls, label_loc):
    """Pure-JAX reference mirroring the PyTorch module (assumes cnt >= 2)."""
    x = cls[:, 0].astype(jnp.float32)
    y = label_cls[:, 0].astype(jnp.float32)
    bce = jnp.maximum(x, 0.0) - x * y + jnp.log1p(jnp.exp(-jnp.abs(x)))
    cls_loss = jnp.mean(bce)

    w = (y != 0.0).astype(jnp.float32)
    cnt = jnp.sum(w)
    loc32 = loc.astype(jnp.float32)
    lloc32 = label_loc.astype(jnp.float32)
    loc_loss = jnp.sum(((loc32 - lloc32) ** 2) * w[:, None]) / (4.0 * cnt)

    def xyxy(b):
        cx, cy, wd, ht = b[:, 0], b[:, 1], b[:, 2], b[:, 3]
        return cx - 0.5 * wd, cy - 0.5 * ht, cx + 0.5 * wd, cy + 0.5 * ht

    ax0, ay0, ax1, ay1 = xyxy(loc32)
    bx0, by0, bx1, by1 = xyxy(lloc32)
    area_a = (ax1 - ax0) * (ay1 - ay0)
    area_b = (bx1 - bx0) * (by1 - by0)
    iw = jnp.maximum(jnp.minimum(ax1, bx1) - jnp.maximum(ax0, bx0), 0.0)
    ih = jnp.maximum(jnp.minimum(ay1, by1) - jnp.maximum(ay0, by0), 0.0)
    inter = iw * ih
    union = area_a + area_b - inter
    iou = inter / union
    ew = jnp.maximum(ax1, bx1) - jnp.minimum(ax0, bx0)
    eh = jnp.maximum(ay1, by1) - jnp.minimum(ay0, by0)
    area_e = ew * eh
    giou = iou - (area_e - union) / area_e

    iou_loss = jnp.sum((1.0 - iou) * w) / cnt
    giou_loss = jnp.sum((1.0 - giou) * w) / cnt
    mean_iou = jnp.sum(iou * w) / cnt
    var = jnp.sum(((iou - mean_iou) ** 2) * w) / (cnt - 1.0)
    iou_std = jnp.sqrt(var)
    total = CLS_WEIGHT * cls_loss + LOC_WEIGHT * loc_loss + GIOU_WEIGHT * iou_loss
    return {
        "cls_loss": cls_loss,
        "loc_loss": loc_loss,
        "giou_loss": giou_loss,
        "iou_loss": iou_loss,
        "iou_var": iou_std,
        "total_loss": total,
    }


if __name__ == "__main__":
    key = jax.random.PRNGKey(0)
    k1, k2, k3 = jax.random.split(key, 3)

    N = 8
    # predicted classification logits
    cls = jax.random.normal(k1, (N, 1), jnp.float32)
    # binary labels: half positive rows (mask), half negative
    label_cls = (jnp.arange(N) % 2 == 0).astype(jnp.float32).reshape(N, 1)
    # boxes in (cx, cy, w, h) with positive extents
    loc = jax.random.uniform(k2, (N, 4), jnp.float32, minval=0.2, maxval=0.6)
    label_loc = jax.random.uniform(k3, (N, 4), jnp.float32, minval=0.2, maxval=0.6)

    outputs = tr2_criterion(cls, loc, label_cls, label_loc)
    jax.block_until_ready(outputs)

    ref = _reference(cls, loc, label_cls, label_loc)
    for k in outputs:
        a = float(outputs[k])
        b = float(ref[k])
        if abs(a - b) > 1e-4 * (1.0 + abs(b)):
            raise AssertionError(f"mismatch for {k}: kernel={a} ref={b}")

    print("KERNEL_OK")
</pallas_src>

<mosaic_0001>
module attributes {stable_mosaic.version = 11 : i64} {
  func.func @kernel(%arg0: i32, %arg1: i32, %arg2: memref<2x8x128xf32, #tpu.memory_space<vmem>>, %arg3: memref<8x8x128xf32, #tpu.memory_space<vmem>>, %arg4: memref<1x6x8x128xf32, #tpu.memory_space<vmem>>, %arg5: memref<6x8x128xf32, #tpu.memory_space<vmem>>) attributes {dimension_semantics = [#tpu.dimension_semantics<parallel>, #tpu.dimension_semantics<arbitrary>], iteration_bounds = array<i64: 1, 1>, scalar_prefetch = 0 : i64, scratch_operands = 1 : i64, tpu.core_type = #tpu.core_type<tc>, window_params = [{transform_indices = @transform_0, window_bounds = array<i64: 2, 8, 128>}, {transform_indices = @transform_1, window_bounds = array<i64: 8, 8, 128>}, {transform_indices = @transform_2, window_bounds = array<i64: 1, 6, 8, 128>}]} {
    %c0_i32 = arith.constant 0 : i32
    %0 = arith.cmpi eq, %arg1, %c0_i32 : i32
    %1 = arith.extui %0 : i1 to i32
    %c0_i32_0 = arith.constant 0 : i32
    %2 = arith.cmpi ne, %1, %c0_i32_0 : i32
    scf.if %2 {
      %cst_86 = arith.constant 0.000000e+00 : f32
      %182 = vector.broadcast %cst_86 : f32 to vector<6x8x128xf32>
      %c0_87 = arith.constant 0 : index
      %c0_88 = arith.constant 0 : index
      %c0_89 = arith.constant 0 : index
      %183 = vector.load %arg5[%c0_87, %c0_88, %c0_89] : memref<6x8x128xf32, #tpu.memory_space<vmem>>, vector<6x8x128xf32>
      tpu.vector_store %arg5[%c0_87, %c0_88, %c0_89], %182 {strides = array<i32>} : memref<6x8x128xf32, #tpu.memory_space<vmem>>, vector<6x8x128xf32>,
    } else {
    }
    %c0 = arith.constant 0 : index
    %c0_1 = arith.constant 0 : index
    %c0_2 = arith.constant 0 : index
    %3 = vector.load %arg2[%c0, %c0_1, %c0_2] : memref<2x8x128xf32, #tpu.memory_space<vmem>>, vector<1x8x128xf32>
    %4 = vector.shape_cast %3 : vector<1x8x128xf32> to vector<8x128xf32>
    %c1 = arith.constant 1 : index
    %c0_3 = arith.constant 0 : index
    %c0_4 = arith.constant 0 : index
    %5 = vector.load %arg2[%c1, %c0_3, %c0_4] : memref<2x8x128xf32, #tpu.memory_space<vmem>>, vector<1x8x128xf32>
    %6 = vector.shape_cast %5 : vector<1x8x128xf32> to vector<8x128xf32>
    %c0_5 = arith.constant 0 : index
    %c0_6 = arith.constant 0 : index
    %c0_7 = arith.constant 0 : index
    %7 = vector.load %arg3[%c0_5, %c0_6, %c0_7] : memref<8x8x128xf32, #tpu.memory_space<vmem>>, vector<1x8x128xf32>
    %8 = vector.shape_cast %7 : vector<1x8x128xf32> to vector<8x128xf32>
    %c1_8 = arith.constant 1 : index
    %c0_9 = arith.constant 0 : index
    %c0_10 = arith.constant 0 : index
    %9 = vector.load %arg3[%c1_8, %c0_9, %c0_10] : memref<8x8x128xf32, #tpu.memory_space<vmem>>, vector<1x8x128xf32>
    %10 = vector.shape_cast %9 : vector<1x8x128xf32> to vector<8x128xf32>
    %c2 = arith.constant 2 : index
    %c0_11 = arith.constant 0 : index
    %c0_12 = arith.constant 0 : index
    %11 = vector.load %arg3[%c2, %c0_11, %c0_12] : memref<8x8x128xf32, #tpu.memory_space<vmem>>, vector<1x8x128xf32>
    %12 = vector.shape_cast %11 : vector<1x8x128xf32> to vector<8x128xf32>
    %c3 = arith.constant 3 : index
    %c0_13 = arith.constant 0 : index
    %c0_14 = arith.constant 0 : index
    %13 = vector.load %arg3[%c3, %c0_13, %c0_14] : memref<8x8x128xf32, #tpu.memory_space<vmem>>, vector<1x8x128xf32>
    %14 = vector.shape_cast %13 : vector<1x8x128xf32> to vector<8x128xf32>
    %c4 = arith.constant 4 : index
    %c0_15 = arith.constant 0 : index
    %c0_16 = arith.constant 0 : index
    %15 = vector.load %arg3[%c4, %c0_15, %c0_16] : memref<8x8x128xf32, #tpu.memory_space<vmem>>, vector<1x8x128xf32>
    %16 = vector.shape_cast %15 : vector<1x8x128xf32> to vector<8x128xf32>
    %c5 = arith.constant 5 : index
    %c0_17 = arith.constant 0 : index
    %c0_18 = arith.constant 0 : index
    %17 = vector.load %arg3[%c5, %c0_17, %c0_18] : memref<8x8x128xf32, #tpu.memory_space<vmem>>, vector<1x8x128xf32>
    %18 = vector.shape_cast %17 : vector<1x8x128xf32> to vector<8x128xf32>
    %c6 = arith.constant 6 : index
    %c0_19 = arith.constant 0 : index
    %c0_20 = arith.constant 0 : index
    %19 = vector.load %arg3[%c6, %c0_19, %c0_20] : memref<8x8x128xf32, #tpu.memory_space<vmem>>, vector<1x8x128xf32>
    %20 = vector.shape_cast %19 : vector<1x8x128xf32> to vector<8x128xf32>
    %c7 = arith.constant 7 : index
    %c0_21 = arith.constant 0 : index
    %c0_22 = arith.constant 0 : index
    %21 = vector.load %arg3[%c7, %c0_21, %c0_22] : memref<8x8x128xf32, #tpu.memory_space<vmem>>, vector<1x8x128xf32>
    %22 = vector.shape_cast %21 : vector<1x8x128xf32> to vector<8x128xf32>
    %cst = arith.constant 0.000000e+00 : f32
    %23 = vector.broadcast %cst : f32 to vector<8x128xf32>
    %24 = arith.maximumf %4, %23 : vector<8x128xf32>
    %25 = arith.mulf %4, %6 : vector<8x128xf32>
    %26 = arith.subf %24, %25 : vector<8x128xf32>
    %27 = math.absf %4 : vector<8x128xf32>
    %cst_23 = arith.constant 0.000000e+00 : f32
    %28 = vector.broadcast %cst_23 : f32 to vector<8x128xf32>
    %29 = arith.subf %28, %27 : vector<8x128xf32>
    %30 = math.exp %29 : vector<8x128xf32>
    %31 = math.log1p %30 : vector<8x128xf32>
    %32 = arith.addf %26, %31 : vector<8x128xf32>
    %c1_i32 = arith.constant 1 : i32
    %33 = arith.muli %arg0, %c1_i32 : i32
    %34 = arith.addi %33, %arg1 : i32
    %c1024_i32 = arith.constant 1024 : i32
    %35 = arith.muli %34, %c1024_i32 : i32
    %c8_i32 = arith.constant 8 : i32
    %36 = arith.subi %c8_i32, %35 : i32
    %c1024_i32_24 = arith.constant 1024 : i32
    %37 = arith.cmpi sge, %36, %c1024_i32_24 : i32
    %38 = arith.extui %37 : i1 to i32
    %c0_i32_25 = arith.constant 0 : i32
    %39 = arith.cmpi ne, %38, %c0_i32_25 : i32
    scf.if %39 {
      %c0_86 = arith.constant 0 : index
      %c0_87 = arith.constant 0 : index
      %c0_88 = arith.constant 0 : index
      %182 = vector.load %arg5[%c0_86, %c0_87, %c0_88] : memref<6x8x128xf32, #tpu.memory_space<vmem>>, vector<1x8x128xf32>
      %183 = vector.shape_cast %182 : vector<1x8x128xf32> to vector<8x128xf32>
      %184 = vector.shape_cast %32 : vector<8x128xf32> to vector<1x8x128xf32>
      %cst_89 = arith.constant dense<0.000000e+00> : vector<8x128xf32>
      %185 = vector.multi_reduction <add>, %184, %cst_89 [0] : vector<1x8x128xf32> to vector<8x128xf32>
      %186 = arith.addf %183, %185 : vector<8x128xf32>
      %c0_90 = arith.constant 0 : index
      %c0_91 = arith.constant 0 : index
      %c0_92 = arith.constant 0 : index
      %187 = vector.load %arg5[%c0_90, %c0_91, %c0_92] : memref<6x8x128xf32, #tpu.memory_space<vmem>>, vector<1x8x128xf32>
      %188 = vector.shape_cast %187 : vector<1x8x128xf32> to vector<8x128xf32>
      %189 = vector.shape_cast %186 : vector<8x128xf32> to vector<1x8x128xf32>
      tpu.vector_store %arg5[%c0_90, %c0_91, %c0_92], %189 {strides = array<i32>} : memref<6x8x128xf32, #tpu.memory_space<vmem>>, vector<1x8x128xf32>,
    } else {
    }
    %c0_i32_26 = arith.constant 0 : i32
    %40 = arith.cmpi sgt, %36, %c0_i32_26 : i32
    %c1024_i32_27 = arith.constant 1024 : i32
    %41 = arith.cmpi slt, %36, %c1024_i32_27 : i32
    %42 = arith.andi %40, %41 : i1
    %43 = arith.extui %42 : i1 to i32
    %c0_i32_28 = arith.constant 0 : i32
    %44 = arith.cmpi ne, %43, %c0_i32_28 : i32
    scf.if %44 {
      %182 = tpu.iota {dimensions = array<i32: 0>} : vector<8x128xi32>
      %183 = tpu.iota {dimensions = array<i32: 1>} : vector<8x128xi32>
      %c128_i32 = arith.constant 128 : i32
      %184 = vector.broadcast %c128_i32 : i32 to vector<8x128xi32>
      %185 = arith.muli %182, %184 : vector<8x128xi32>
      %186 = arith.addi %185, %183 : vector<8x128xi32>
      %c0_86 = arith.constant 0 : index
      %c0_87 = arith.constant 0 : index
      %c0_88 = arith.constant 0 : index
      %187 = vector.load %arg5[%c0_86, %c0_87, %c0_88] : memref<6x8x128xf32, #tpu.memory_space<vmem>>, vector<1x8x128xf32>
      %188 = vector.shape_cast %187 : vector<1x8x128xf32> to vector<8x128xf32>
      %189 = vector.broadcast %36 : i32 to vector<8x128xi32>
      %190 = arith.cmpi slt, %186, %189 : vector<8x128xi32>
      %cst_89 = arith.constant 0.000000e+00 : f32
      %191 = vector.broadcast %cst_89 : f32 to vector<8x128xf32>
      %192 = arith.select %190, %32, %191 : vector<8x128xi1>, vector<8x128xf32>
      %193 = vector.shape_cast %192 : vector<8x128xf32> to vector<1x8x128xf32>
      %cst_90 = arith.constant dense<0.000000e+00> : vector<8x128xf32>
      %194 = vector.multi_reduction <add>, %193, %cst_90 [0] : vector<1x8x128xf32> to vector<8x128xf32>
      %195 = arith.addf %188, %194 : vector<8x128xf32>
      %c0_91 = arith.constant 0 : index
      %c0_92 = arith.constant 0 : index
      %c0_93 = arith.constant 0 : index
      %196 = vector.load %arg5[%c0_91, %c0_92, %c0_93] : memref<6x8x128xf32, #tpu.memory_space<vmem>>, vector<1x8x128xf32>
      %197 = vector.shape_cast %196 : vector<1x8x128xf32> to vector<8x128xf32>
      %198 = vector.shape_cast %195 : vector<8x128xf32> to vector<1x8x128xf32>
      tpu.vector_store %arg5[%c0_91, %c0_92, %c0_93], %198 {strides = array<i32>} : memref<6x8x128xf32, #tpu.memory_space<vmem>>, vector<1x8x128xf32>,
    } else {
    }
    %cst_29 = arith.constant 0.000000e+00 : f32
    %45 = vector.broadcast %cst_29 : f32 to vector<8x128xf32>
    %46 = arith.cmpf one, %6, %45 : vector<8x128xf32>
    %47 = arith.subf %8, %16 : vector<8x128xf32>
    %48 = arith.subf %10, %18 : vector<8x128xf32>
    %49 = arith.subf %12, %20 : vector<8x128xf32>
    %50 = arith.subf %14, %22 : vector<8x128xf32>
    %51 = arith.mulf %47, %47 : vector<8x128xf32>
    %52 = arith.mulf %48, %48 : vector<8x128xf32>
    %53 = arith.addf %51, %52 : vector<8x128xf32>
    %54 = arith.mulf %49, %49 : vector<8x128xf32>
    %55 = arith.addf %53, %54 : vector<8x128xf32>
    %56 = arith.mulf %50, %50 : vector<8x128xf32>
    %57 = arith.addf %55, %56 : vector<8x128xf32>
    %c1_30 = arith.constant 1 : index
    %c0_31 = arith.constant 0 : index
    %c0_32 = arith.constant 0 : index
    %58 = vector.load %arg5[%c1_30, %c0_31, %c0_32] : memref<6x8x128xf32, #tpu.memory_space<vmem>>, vector<1x8x128xf32>
    %59 = vector.shape_cast %58 : vector<1x8x128xf32> to vector<8x128xf32>
    %cst_33 = arith.constant 0.000000e+00 : f32
    %60 = vector.broadcast %cst_33 : f32 to vector<8x128xf32>
    %61 = arith.select %46, %57, %60 : vector<8x128xi1>, vector<8x128xf32>
    %62 = vector.shape_cast %61 : vector<8x128xf32> to vector<1x8x128xf32>
    %cst_34 = arith.constant dense<0.000000e+00> : vector<8x128xf32>
    %63 = vector.multi_reduction <add>, %62, %cst_34 [0] : vector<1x8x128xf32> to vector<8x128xf32>
    %64 = arith.addf %59, %63 : vector<8x128xf32>
    %c1_35 = arith.constant 1 : index
    %c0_36 = arith.constant 0 : index
    %c0_37 = arith.constant 0 : index
    %65 = vector.load %arg5[%c1_35, %c0_36, %c0_37] : memref<6x8x128xf32, #tpu.memory_space<vmem>>, vector<1x8x128xf32>
    %66 = vector.shape_cast %65 : vector<1x8x128xf32> to vector<8x128xf32>
    %67 = vector.shape_cast %64 : vector<8x128xf32> to vector<1x8x128xf32>
    tpu.vector_store %arg5[%c1_35, %c0_36, %c0_37], %67 {strides = array<i32>} : memref<6x8x128xf32, #tpu.memory_space<vmem>>, vector<1x8x128xf32>,
    %cst_38 = arith.constant 5.000000e-01 : f32
    %68 = vector.broadcast %cst_38 : f32 to vector<8x128xf32>
    %69 = arith.mulf %68, %12 : vector<8x128xf32>
    %70 = arith.subf %8, %69 : vector<8x128xf32>
    %cst_39 = arith.constant 5.000000e-01 : f32
    %71 = vector.broadcast %cst_39 : f32 to vector<8x128xf32>
    %72 = arith.mulf %71, %12 : vector<8x128xf32>
    %73 = arith.addf %8, %72 : vector<8x128xf32>
    %cst_40 = arith.constant 5.000000e-01 : f32
    %74 = vector.broadcast %cst_40 : f32 to vector<8x128xf32>
    %75 = arith.mulf %74, %14 : vector<8x128xf32>
    %76 = arith.subf %10, %75 : vector<8x128xf32>
    %cst_41 = arith.constant 5.000000e-01 : f32
    %77 = vector.broadcast %cst_41 : f32 to vector<8x128xf32>
    %78 = arith.mulf %77, %14 : vector<8x128xf32>
    %79 = arith.addf %10, %78 : vector<8x128xf32>
    %cst_42 = arith.constant 5.000000e-01 : f32
    %80 = vector.broadcast %cst_42 : f32 to vector<8x128xf32>
    %81 = arith.mulf %80, %20 : vector<8x128xf32>
    %82 = arith.subf %16, %81 : vector<8x128xf32>
    %cst_43 = arith.constant 5.000000e-01 : f32
    %83 = vector.broadcast %cst_43 : f32 to vector<8x128xf32>
    %84 = arith.mulf %83, %20 : vector<8x128xf32>
    %85 = arith.addf %16, %84 : vector<8x128xf32>
    %cst_44 = arith.constant 5.000000e-01 : f32
    %86 = vector.broadcast %cst_44 : f32 to vector<8x128xf32>
    %87 = arith.mulf %86, %22 : vector<8x128xf32>
    %88 = arith.subf %18, %87 : vector<8x128xf32>
    %cst_45 = arith.constant 5.000000e-01 : f32
    %89 = vector.broadcast %cst_45 : f32 to vector<8x128xf32>
    %90 = arith.mulf %89, %22 : vector<8x128xf32>
    %91 = arith.addf %18, %90 : vector<8x128xf32>
    %92 = arith.subf %73, %70 : vector<8x128xf32>
    %93 = arith.subf %79, %76 : vector<8x128xf32>
    %94 = arith.mulf %92, %93 : vector<8x128xf32>
    %95 = arith.subf %85, %82 : vector<8x128xf32>
    %96 = arith.subf %91, %88 : vector<8x128xf32>
    %97 = arith.mulf %95, %96 : vector<8x128xf32>
    %98 = arith.minimumf %73, %85 : vector<8x128xf32>
    %99 = arith.maximumf %70, %82 : vector<8x128xf32>
    %100 = arith.subf %98, %99 : vector<8x128xf32>
    %cst_46 = arith.constant 0.000000e+00 : f32
    %101 = vector.broadcast %cst_46 : f32 to vector<8x128xf32>
    %102 = arith.maximumf %100, %101 : vector<8x128xf32>
    %103 = arith.minimumf %79, %91 : vector<8x128xf32>
    %104 = arith.maximumf %76, %88 : vector<8x128xf32>
    %105 = arith.subf %103, %104 : vector<8x128xf32>
    %cst_47 = arith.constant 0.000000e+00 : f32
    %106 = vector.broadcast %cst_47 : f32 to vector<8x128xf32>
    %107 = arith.maximumf %105, %106 : vector<8x128xf32>
    %108 = arith.mulf %102, %107 : vector<8x128xf32>
    %109 = arith.addf %94, %97 : vector<8x128xf32>
    %110 = arith.subf %109, %108 : vector<8x128xf32>
    %cst_48 = arith.constant 1.000000e+00 : f32
    %111 = vector.broadcast %cst_48 : f32 to vector<8x128xf32>
    %112 = arith.select %46, %110, %111 : vector<8x128xi1>, vector<8x128xf32>
    %113 = tpu.reciprocal %112 {approx = true} : vector<8x128xf32> -> vector<8x128xf32>
    %114 = arith.mulf %112, %113 : vector<8x128xf32>
    %cst_49 = arith.constant 2.000000e+00 : f32
    %115 = vector.broadcast %cst_49 : f32 to vector<8x128xf32>
    %116 = arith.subf %115, %114 : vector<8x128xf32>
    %117 = arith.mulf %113, %116 : vector<8x128xf32>
    %118 = arith.mulf %108, %117 : vector<8x128xf32>
    %119 = arith.maximumf %73, %85 : vector<8x128xf32>
    %120 = arith.minimumf %70, %82 : vector<8x128xf32>
    %121 = arith.subf %119, %120 : vector<8x128xf32>
    %cst_50 = arith.constant 0.000000e+00 : f32
    %122 = vector.broadcast %cst_50 : f32 to vector<8x128xf32>
    %123 = arith.maximumf %121, %122 : vector<8x128xf32>
    %124 = arith.maximumf %79, %91 : vector<8x128xf32>
    %125 = arith.minimumf %76, %88 : vector<8x128xf32>
    %126 = arith.subf %124, %125 : vector<8x128xf32>
    %cst_51 = arith.constant 0.000000e+00 : f32
    %127 = vector.broadcast %cst_51 : f32 to vector<8x128xf32>
    %128 = arith.maximumf %126, %127 : vector<8x128xf32>
    %129 = arith.mulf %123, %128 : vector<8x128xf32>
    %cst_52 = arith.constant 1.000000e+00 : f32
    %130 = vector.broadcast %cst_52 : f32 to vector<8x128xf32>
    %131 = arith.select %46, %129, %130 : vector<8x128xi1>, vector<8x128xf32>
    %132 = tpu.reciprocal %131 {approx = true} : vector<8x128xf32> -> vector<8x128xf32>
    %133 = arith.mulf %131, %132 : vector<8x128xf32>
    %cst_53 = arith.constant 2.000000e+00 : f32
    %134 = vector.broadcast %cst_53 : f32 to vector<8x128xf32>
    %135 = arith.subf %134, %133 : vector<8x128xf32>
    %136 = arith.mulf %132, %135 : vector<8x128xf32>
    %137 = arith.subf %129, %110 : vector<8x128xf32>
    %138 = arith.mulf %137, %136 : vector<8x128xf32>
    %139 = arith.subf %118, %138 : vector<8x128xf32>
    %cst_54 = arith.constant 0.000000e+00 : f32
    %140 = vector.broadcast %cst_54 : f32 to vector<8x128xf32>
    %141 = arith.select %46, %118, %140 : vector<8x128xi1>, vector<8x128xf32>
    %cst_55 = arith.constant 0.000000e+00 : f32
    %142 = vector.broadcast %cst_55 : f32 to vector<8x128xf32>
    %143 = arith.select %46, %139, %142 : vector<8x128xi1>, vector<8x128xf32>
    %c2_56 = arith.constant 2 : index
    %c0_57 = arith.constant 0 : index
    %c0_58 = arith.constant 0 : index
    %144 = vector.load %arg5[%c2_56, %c0_57, %c0_58] : memref<6x8x128xf32, #tpu.memory_space<vmem>>, vector<1x8x128xf32>
    %145 = vector.shape_cast %144 : vector<1x8x128xf32> to vector<8x128xf32>
    %146 = vector.shape_cast %141 : vector<8x128xf32> to vector<1x8x128xf32>
    %cst_59 = arith.constant dense<0.000000e+00> : vector<8x128xf32>
    %147 = vector.multi_reduction <add>, %146, %cst_59 [0] : vector<1x8x128xf32> to vector<8x128xf32>
    %148 = arith.addf %145, %147 : vector<8x128xf32>
    %c2_60 = arith.constant 2 : index
    %c0_61 = arith.constant 0 : index
    %c0_62 = arith.constant 0 : index
    %149 = vector.load %arg5[%c2_60, %c0_61, %c0_62] : memref<6x8x128xf32, #tpu.memory_space<vmem>>, vector<1x8x128xf32>
    %150 = vector.shape_cast %149 : vector<1x8x128xf32> to vector<8x128xf32>
    %151 = vector.shape_cast %148 : vector<8x128xf32> to vector<1x8x128xf32>
    tpu.vector_store %arg5[%c2_60, %c0_61, %c0_62], %151 {strides = array<i32>} : memref<6x8x128xf32, #tpu.memory_space<vmem>>, vector<1x8x128xf32>,
    %c3_63 = arith.constant 3 : index
    %c0_64 = arith.constant 0 : index
    %c0_65 = arith.constant 0 : index
    %152 = vector.load %arg5[%c3_63, %c0_64, %c0_65] : memref<6x8x128xf32, #tpu.memory_space<vmem>>, vector<1x8x128xf32>
    %153 = vector.shape_cast %152 : vector<1x8x128xf32> to vector<8x128xf32>
    %154 = vector.shape_cast %143 : vector<8x128xf32> to vector<1x8x128xf32>
    %cst_66 = arith.constant dense<0.000000e+00> : vector<8x128xf32>
    %155 = vector.multi_reduction <add>, %154, %cst_66 [0] : vector<1x8x128xf32> to vector<8x128xf32>
    %156 = arith.addf %153, %155 : vector<8x128xf32>
    %c3_67 = arith.constant 3 : index
    %c0_68 = arith.constant 0 : index
    %c0_69 = arith.constant 0 : index
    %157 = vector.load %arg5[%c3_67, %c0_68, %c0_69] : memref<6x8x128xf32, #tpu.memory_space<vmem>>, vector<1x8x128xf32>
    %158 = vector.shape_cast %157 : vector<1x8x128xf32> to vector<8x128xf32>
    %159 = vector.shape_cast %156 : vector<8x128xf32> to vector<1x8x128xf32>
    tpu.vector_store %arg5[%c3_67, %c0_68, %c0_69], %159 {strides = array<i32>} : memref<6x8x128xf32, #tpu.memory_space<vmem>>, vector<1x8x128xf32>,
    %c4_70 = arith.constant 4 : index
    %c0_71 = arith.constant 0 : index
    %c0_72 = arith.constant 0 : index
    %160 = vector.load %arg5[%c4_70, %c0_71, %c0_72] : memref<6x8x128xf32, #tpu.memory_space<vmem>>, vector<1x8x128xf32>
    %161 = vector.shape_cast %160 : vector<1x8x128xf32> to vector<8x128xf32>
    %162 = arith.mulf %141, %141 : vector<8x128xf32>
    %163 = vector.shape_cast %162 : vector<8x128xf32> to vector<1x8x128xf32>
    %cst_73 = arith.constant dense<0.000000e+00> : vector<8x128xf32>
    %164 = vector.multi_reduction <add>, %163, %cst_73 [0] : vector<1x8x128xf32> to vector<8x128xf32>
    %165 = arith.addf %161, %164 : vector<8x128xf32>
    %c4_74 = arith.constant 4 : index
    %c0_75 = arith.constant 0 : index
    %c0_76 = arith.constant 0 : index
    %166 = vector.load %arg5[%c4_74, %c0_75, %c0_76] : memref<6x8x128xf32, #tpu.memory_space<vmem>>, vector<1x8x128xf32>
    %167 = vector.shape_cast %166 : vector<1x8x128xf32> to vector<8x128xf32>
    %168 = vector.shape_cast %165 : vector<8x128xf32> to vector<1x8x128xf32>
    tpu.vector_store %arg5[%c4_74, %c0_75, %c0_76], %168 {strides = array<i32>} : memref<6x8x128xf32, #tpu.memory_space<vmem>>, vector<1x8x128xf32>,
    %c5_77 = arith.constant 5 : index
    %c0_78 = arith.constant 0 : index
    %c0_79 = arith.constant 0 : index
    %169 = vector.load %arg5[%c5_77, %c0_78, %c0_79] : memref<6x8x128xf32, #tpu.memory_space<vmem>>, vector<1x8x128xf32>
    %170 = vector.shape_cast %169 : vector<1x8x128xf32> to vector<8x128xf32>
    %171 = arith.extui %46 : vector<8x128xi1> to vector<8x128xi32>
    %172 = arith.sitofp %171 : vector<8x128xi32> to vector<8x128xf32>
    %173 = vector.shape_cast %172 : vector<8x128xf32> to vector<1x8x128xf32>
    %cst_80 = arith.constant dense<0.000000e+00> : vector<8x128xf32>
    %174 = vector.multi_reduction <add>, %173, %cst_80 [0] : vector<1x8x128xf32> to vector<8x128xf32>
    %175 = arith.addf %170, %174 : vector<8x128xf32>
    %c5_81 = arith.constant 5 : index
    %c0_82 = arith.constant 0 : index
    %c0_83 = arith.constant 0 : index
    %176 = vector.load %arg5[%c5_81, %c0_82, %c0_83] : memref<6x8x128xf32, #tpu.memory_space<vmem>>, vector<1x8x128xf32>
    %177 = vector.shape_cast %176 : vector<1x8x128xf32> to vector<8x128xf32>
    %178 = vector.shape_cast %175 : vector<8x128xf32> to vector<1x8x128xf32>
    tpu.vector_store %arg5[%c5_81, %c0_82, %c0_83], %178 {strides = array<i32>} : memref<6x8x128xf32, #tpu.memory_space<vmem>>, vector<1x8x128xf32>,
    %c0_i32_84 = arith.constant 0 : i32
    %179 = arith.cmpi eq, %arg1, %c0_i32_84 : i32
    %180 = arith.extui %179 : i1 to i32
    %c0_i32_85 = arith.constant 0 : i32
    %181 = arith.cmpi ne, %180, %c0_i32_85 : i32
    scf.if %181 {
      %c0_86 = arith.constant 0 : index
      %c0_87 = arith.constant 0 : index
      %c0_88 = arith.constant 0 : index
      %182 = vector.load %arg5[%c0_86, %c0_87, %c0_88] : memref<6x8x128xf32, #tpu.memory_space<vmem>>, vector<6x8x128xf32>
      %c0_89 = arith.constant 0 : index
      %c0_90 = arith.constant 0 : index
      %c0_91 = arith.constant 0 : index
      %c0_92 = arith.constant 0 : index
      %183 = vector.load %arg4[%c0_89, %c0_90, %c0_91, %c0_92] : memref<1x6x8x128xf32, #tpu.memory_space<vmem>>, vector<1x6x8x128xf32>
      %184 = vector.shape_cast %183 : vector<1x6x8x128xf32> to vector<6x8x128xf32>
      %185 = vector.shape_cast %182 : vector<6x8x128xf32> to vector<1x6x8x128xf32>
      tpu.vector_store %arg4[%c0_89, %c0_90, %c0_91, %c0_92], %185 {strides = array<i32>} : memref<1x6x8x128xf32, #tpu.memory_space<vmem>>, vector<1x6x8x128xf32>,
    } else {
    }
    return
  }
  func.func @transform_0(%arg0: i32, %arg1: i32) -> (i32, i32, i32) {
    %c1_i32 = arith.constant 1 : i32
    %0 = arith.muli %arg0, %c1_i32 : i32
    %1 = arith.addi %0, %arg1 : i32
    %c0_i32 = arith.constant 0 : i32
    %c0_i32_0 = arith.constant 0 : i32
    %c0_i32_1 = arith.constant 0 : i32
    return %c0_i32, %1, %c0_i32_0 : i32, i32, i32
  }
  func.func @transform_1(%arg0: i32, %arg1: i32) -> (i32, i32, i32) {
    %c1_i32 = arith.constant 1 : i32
    %0 = arith.muli %arg0, %c1_i32 : i32
    %1 = arith.addi %0, %arg1 : i32
    %c0_i32 = arith.constant 0 : i32
    %c0_i32_0 = arith.constant 0 : i32
    %c0_i32_1 = arith.constant 0 : i32
    return %c0_i32, %1, %c0_i32_0 : i32, i32, i32
  }
  func.func @transform_2(%arg0: i32, %arg1: i32) -> (i32, i32, i32, i32) {
    %c0_i32 = arith.constant 0 : i32
    %c0_i32_0 = arith.constant 0 : i32
    %c0_i32_1 = arith.constant 0 : i32
    %c0_i32_2 = arith.constant 0 : i32
    return %arg0, %c0_i32, %c0_i32_0, %c0_i32_1 : i32, i32, i32, i32
  }
}

</mosaic_0001>

<bundles_post_ra>
// kernel: tpu_custom_call.1
= control target key start
LH: loop header
LB: loop body
LE: loop exit
PB: predicated region body
PF: predicated region fallthrough
CT: control target
= control target key end

     0   :  { %7 = vsyncpa [#allocation4], 0  ;;  %s392_s0 = inlined_call_operand.hbm [shape: f32[2,8,128], index: 0, kind: input, shape index: {}]   ;;  %s393_s1 = inlined_call_operand.hbm [shape: f32[8,8,128], index: 1, kind: input, shape index: {}]   ;;  %s394_s2 = inlined_call_operand.hbm [shape: f32[1,6,8,128], index: 2, kind: output, shape index: {}]  }
   0x1   :  { %8 = vsyncpa [#allocation7], 0 }
   0x2   :  { %9 = vsyncpa [#allocation5], 0  ;;  %s332_s9 = smov [#allocation3]  }
   0x3   :  { %s18_s10 = sshll.u32 %s332_s9, 4  ;;  %s19_s10 = int_to_ptr.vmem [resolvable:$true] %s18_s10 }
   0x4   :  { %s274_s11 = scalar_lea.vmem %s19_s10, 256  ;;  %p279_p1 = scmp.lt.s32.totalorder %s19_s10, %s19_s10 }
   0x5   :  { %p275_p0 = scmp.ne.s32.totalorder %s19_s10, %s274_s11  ;;  %p280_p2 = scmp.lt.s32.totalorder %s274_s11, %s274_s11 }
   0x7   :  { %p281_p3 = por %p280_p2, %p279_p1 }
   0x9   :  { %p282_p4 = pnand %p281_p3, %p275_p0 }
   0xb   :  { %285 = shalt.err (!%p282_p4)
}
   0xc   :  { %s333_s12 = smov 128   ;;  %s334_s13 = smov 8  }
   0xd   :  { %24 = dma.hbm_to_vmem [thread:$0]  %s392_s0, 256, %s19_s10, [#allocation4], %s333_s12, %s333_s12, %s334_s13  }
   0xe   :  { %s335_s16 = smov [#allocation6]  }
   0xf   :  { %s33_s17 = sshll.u32 %s335_s16, 4  ;;  %s34_s17 = int_to_ptr.vmem [resolvable:$true] %s33_s17 }
  0x10   :  { %s294_s18 = scalar_lea.vmem %s34_s17, 1024  ;;  %p299_p6 = scmp.lt.s32.totalorder %s34_s17, %s34_s17 }
  0x11   :  { %p295_p5 = scmp.ne.s32.totalorder %s34_s17, %s294_s18  ;;  %p300_p7 = scmp.lt.s32.totalorder %s294_s18, %s294_s18 }
  0x13   :  { %p301_p8 = por %p300_p7, %p299_p6 }
  0x15   :  { %p302_p9 = pnand %p301_p8, %p295_p5 }
  0x17   :  { %305 = shalt.err (!%p302_p9)
}
  0x18   :  { %39 = dma.hbm_to_vmem [thread:$0]  %s393_s1, 1024, %s34_s17, [#allocation7], %s333_s12, %s333_s12, %s334_s13  }
  0x19   :  { %326 = dma.done.wait [#allocation4], 256  }
  0x1a   :  { %327 = vsyncadd [#allocation4], 4294967040 }
  0x1b   :  { %328 = dma.done.wait [#allocation7], 1024  }
  0x1c   :  { %329 = vsyncadd [#allocation7], 4294966272  ;;  %v365_v0 = vld [vmem:[#allocation3] sm:$0xff]  ;;  %v367_v1 = vld [vmem:[#allocation3 + $0x8] sm:$0xff]  ;;  %v336_v37 = vmov 0.0   ;;  %s337_s0 = smov [#allocation8]  }
  0x1d   :  { %v79_v2 = vand.u32 2147483647, %v365_v0  ;;  %v61_v3 = vld [vmem:[#allocation6] sm:$0xff]  ;;  %v63_v4 = vld [vmem:[#allocation6 + $0x8] sm:$0xff]  ;;  %v65_v5 = vld [vmem:[#allocation6 + $0x10] sm:$0xff]  ;;  %vm123_vm0 = vcmp.ne.f32.partialorder %v367_v1, 0.0 }
  0x1e   :  { %v67_v6 = vld [vmem:[#allocation6 + $0x18] sm:$0xff]  ;;  %v69_v7 = vld [vmem:[#allocation6 + $0x20] sm:$0xff]  ;;  %v71_v8 = vld [vmem:[#allocation6 + $0x28] sm:$0xff]  ;;  %v141_v9 = vmul.f32 0.5, %v65_v5  ;;  %v251_v38 = vsel %vm123_vm0, 1.0, %v336_v37  ;;  %s238_s1 = sshll.u32 %s337_s0, 4  ;;  %s239_s1 = int_to_ptr.vmem [resolvable:$true] %s238_s1 }
  0x1f   :  { %v80_v10 = vsub.f32 0.0, %v79_v2  ;;  %v73_v11 = vld [vmem:[#allocation6 + $0x30] sm:$0xff]  ;;  %v75_v12 = vld [vmem:[#allocation6 + $0x38] sm:$0xff]  ;;  %v124_v13 = vsub.f32 %v61_v3, %v69_v7  ;;  %v125_v14 = vsub.f32 %v63_v4, %v71_v8  ;;  %v144_v22 = vmul.f32 0.5, %v67_v6  ;;  %232 = vst [vmem:[#allocation8 + $0x28] sm:$0xff] %v251_v38  ;;  %s306_s21 = scalar_lea.vmem %s239_s1, 768  ;;  %p311_p11 = scmp.lt.s32.totalorder %s239_s1, %s239_s1 }
  0x20   :  { %v126_v15 = vsub.f32 %v65_v5, %v73_v11  ;;  %v127_v16 = vsub.f32 %v67_v6, %v75_v12  ;;  %v142_v17 = vsub.f32 %v61_v3, %v141_v9  ;;  %v143_v18 = vadd.f32 %v141_v9, %v61_v3  ;;  %p307_p10 = scmp.ne.s32.totalorder %s239_s1, %s306_s21  ;;  %p312_p12 = scmp.lt.s32.totalorder %s306_s21, %s306_s21 }
  0x21   :  { %v81_v19 = vmul.f32 1.442695, %v80_v10  ;;  %v128_v20 = vmul.f32 %v124_v13, %v124_v13  ;;  %v129_v21 = vmul.f32 %v125_v14, %v125_v14  ;;  %v147_v25 = vmul.f32 0.5, %v73_v11 }
  0x22   :  { %v131_v23 = vmul.f32 %v126_v15, %v126_v15  ;;  %v133_v24 = vmul.f32 %v127_v16, %v127_v16  ;;  %v150_v26 = vmul.f32 0.5, %v75_v12  ;;  %v145_v28 = vsub.f32 %v63_v4, %v144_v22  ;;  %p313_p13 = por %p312_p12, %p311_p11 }
  0x23   :  { %258 = vpow2.f32 %v81_v19  ;;  %v130_v27 = vadd.f32 %v129_v21, %v128_v20  ;;  %v146_v29 = vadd.f32 %v144_v22, %v63_v4  ;;  %v148_v30 = vsub.f32 %v69_v7, %v147_v25 }
  0x24   :  { %v149_v31 = vadd.f32 %v147_v25, %v69_v7  ;;  %v151_v32 = vsub.f32 %v71_v8, %v150_v26  ;;  %v152_v33 = vadd.f32 %v150_v26, %v71_v8  ;;  %v153_v35 = vsub.f32 %v143_v18, %v142_v17  ;;  %p314_p0 = pnand %p313_p13, %p307_p10 }
  0x25   :  { %v132_v34 = vadd.f32 %v131_v23, %v130_v27  ;;  %v154_v36 = vsub.f32 %v146_v29, %v145_v28  ;;  %v160_v42 = vmax.f32 %v142_v17, %v148_v30  ;;  %v177_v50 = vmin.f32 %v142_v17, %v148_v30 }
  0x26   :  { %v156_v39 = vsub.f32 %v149_v31, %v148_v30  ;;  %v157_v40 = vsub.f32 %v152_v33, %v151_v32  ;;  %v159_v41 = vmin.f32 %v143_v18, %v149_v31  ;;  %v163_v45 = vmin.f32 %v146_v29, %v152_v33 }
  0x27   :  { %v134_v43 = vadd.f32 %v133_v24, %v132_v34  ;;  %v155_v44 = vmul.f32 %v154_v36, %v153_v35  ;;  %v164_v46 = vmax.f32 %v145_v28, %v151_v32  ;;  %v176_v49 = vmax.f32 %v143_v18, %v149_v31 }
  0x28   :  { %v158_v47 = vmul.f32 %v157_v40, %v156_v39  ;;  %v161_v48 = vsub.f32 %v159_v41, %v160_v42  ;;  %v180_v53 = vmax.f32 %v146_v29, %v152_v33  ;;  %v181_v54 = vmin.f32 %v145_v28, %v151_v32 }
  0x29   :  { %v137_v51 = vsel %vm123_vm0, %v134_v43, 0.0  ;;  %v165_v52 = vsub.f32 %v163_v45, %v164_v46  ;;  %v178_v56 = vsub.f32 %v176_v49, %v177_v50  ;;  %v110_v7 = vlaneseq }
  0x2a   :  { %228 = vst [vmem:[#allocation8 + $0x8] sm:$0xff] %v137_v51  ;;  %v162_v55 = vmax.f32 %v161_v48, 0.0  ;;  %v168_v58 = vadd.f32 %v158_v47, %v155_v44  ;;  %v182_v59 = vsub.f32 %v180_v53, %v181_v54  ;;  %v76_v13 = vmax.f32 %v365_v0, 0.0 }
  0x2b   :  { %v166_v57 = vmax.f32 %v165_v52, 0.0  ;;  %v179_v60 = vmax.f32 %v178_v56, 0.0  ;;  %v111_v9 = vshrl.u32 %v110_v7, 7  ;;  %v113_v11 = vand.u32 127, %v110_v7 }
  0x2c   :  { %v183_v62 = vmax.f32 %v182_v59, 0.0  ;;  %v77_v14 = vmul.f32 %v367_v1, %v365_v0 }
  0x2d   :  { %v167_v61 = vmul.f32 %v166_v57, %v162_v55  ;;  %v114_v12 = vmul.u32 128, %v111_v9 }
  0x2e   :  { %v184_v2 = vmul.f32 %v183_v62, %v179_v60  ;;  %v78_v20 = vsub.f32 %v76_v13, %v77_v14 }
  0x2f   :  { %v169_v63 = vsub.f32 %v168_v58, %v167_v61  ;;  %v115_v18 = vadd.s32 %v114_v12, %v113_v11 }
  0x30   :  { %v259_v3 = vpop.eup %258  ;;  %v185_v6 = vsel %vm123_vm0, %v184_v2, 1.0 }
  0x31   :  { %v83_v4 = vadd.f32 1.0, %v259_v3  ;;  %v170_v5 = vsel %vm123_vm0, %v169_v63, 1.0  ;;  %v86_v8 = vmul.f32 -0.5, %v259_v3  ;;  %v89_v15 = vand.u32 2147483647, %v259_v3 }
  0x32   :  { %260 = vrcp.f32 %v170_v5  ;;  %vm118_vm2 = vcmp.lt.s32.totalorder %v115_v18, 8  ;;  %v190_v30 = vsub.f32 %v184_v2, %v169_v63 }
  0x33   :  { %262 = vlog2.f32 %v83_v4  ;;  %v87_v10 = vadd.f32 1.0, %v86_v8  ;;  %vm90_vm1 = vcmp.lt.f32.partialorder %v89_v15, 0.0004427343 }
  0x34   :  { %264 = vrcp.f32 %v185_v6 }
  0x35   :  { %v88_v17 = vmul.f32 %v259_v3, %v87_v10 }
  0x3f   :  { %v261_v16 = vpop.eup %260 }
  0x40   :  { %v263_v19 = vpop.eup %262  ;;  %v172_v21 = vmul.f32 %v261_v16, %v170_v5 }
  0x41   :  { %v265_v22 = vpop.eup %264  ;;  %v85_v23 = vmul.f32 0.6931472, %v263_v19 }
  0x42   :  { %v173_v24 = vsub.f32 2.0, %v172_v21  ;;  %v187_v25 = vmul.f32 %v265_v22, %v185_v6 }
  0x43   :  { %v91_v26 = vsel %vm90_vm1, %v88_v17, %v85_v23 }
  0x44   :  { %v92_v27 = vadd.f32 %v91_v26, %v78_v20  ;;  %v174_v28 = vmul.f32 %v261_v16, %v173_v24  ;;  %v188_v29 = vsub.f32 2.0, %v187_v25 }
  0x46   :  { %v119_v31 = vsel %vm118_vm2, %v92_v27, 0.0  ;;  %v175_v0 = vmul.f32 %v174_v28, %v167_v61  ;;  %v189_v32 = vmul.f32 %v265_v22, %v188_v29 }
  0x47   :  { %227 = vst [vmem:[#allocation8] sm:$0xff] %v119_v31 }
  0x48   :  { %v193_v33 = vsel %vm123_vm0, %v175_v0, 0.0  ;;  %v191_v34 = vmul.f32 %v190_v30, %v189_v32 }
  0x49   :  { %229 = vst [vmem:[#allocation8 + $0x10] sm:$0xff] %v193_v33  ;;  %v207_v35 = vmul.f32 %v193_v33, %v193_v33 }
  0x4a   :  { %v192_v36 = vsub.f32 %v175_v0, %v191_v34 }
  0x4b   :  { %231 = vst [vmem:[#allocation8 + $0x20] sm:$0xff] %v207_v35 }
  0x4c   :  { %v194_v37 = vsel %vm123_vm0, %v192_v36, 0.0 }
  0x4d   :  { %230 = vst [vmem:[#allocation8 + $0x18] sm:$0xff] %v194_v37 }
  0x4e   :  { %317 = shalt.err (!%p314_p0)
}
  0x4f   :  { %244 = dma.vmem_to_hbm [thread:$0]  %s239_s1, 768, %s394_s2, [#allocation5], %s333_s12, %s333_s12, %s334_s13  }
  0x50   :  { %330 = dma.done.wait [#allocation5], 768  }
  0x51   :  { %331 = vsyncadd [#allocation5], 4294966528 }
  0x52   :  { %248 = vsyncpa [#allocation4], 1 }
  0x53   :  { %249 = vsyncpa [#allocation7], 1 }
  0x54   :  { %250 = vsyncpa [#allocation5], 1 }

</bundles_post_ra>
